<compile_context>
chip_gen: v5e
topology: v5e:2x2
jax: 0.10.0
libtpu: 0.0.40
codegen_flags: <defaults>
</compile_context>

<pallas_src>
import jax
import jax.numpy as jnp
from jax.experimental import pallas as pl
from jax.experimental.pallas import tpu as pltpu


def _round_up(x, m):
    return ((x + m - 1) // m) * m


def _make_nll_kernel(tile_v):
    def kernel(logp_ref, gold_ref, sum_ref):
        v = pl.program_id(2)

        # New (batch, seq-tile) output block: zero it on the first vocab tile.
        @pl.when(v == 0)
        def _init():
            sum_ref[...] = jnp.zeros_like(sum_ref)

        logp = logp_ref[...].astype(jnp.float32)              # (1, ts, tv)

        # Fold this vocab tile's offset into the (pre-masked) gold ids. Ignored
        # rows carry -1 and can never match the [0, tv) iota; gold ids that live
        # in another vocab tile fall outside [0, tv) and never match either.
        gold_local = gold_ref[...] - v * tile_v               # (1, ts, 1)
        vocab = jax.lax.broadcasted_iota(jnp.int32, (1, 1, tile_v), 2)
        hit = vocab == gold_local                             # (1, ts, tv)

        # Keep the where-select (NOT logp * hit): ragged seq/vocab tail regions
        # may hold garbage (incl. NaN/Inf) that must not leak into the sum.
        sum_ref[...] += jnp.sum(jnp.where(hit, logp, 0.0),
                                axis=(1, 2), keepdims=True)

    return kernel


def transformer_loss(model_output, tgt, pad_id, *, tile_s=512, tile_v=4096):
    """Pallas equivalent of TransformerLoss(pad_id)(model_output, tgt).

    model_output: (B, S, V) log-probabilities (f32 or bf16).
    tgt:          (B, S) integer token ids.
    Returns a scalar float32 loss (mean NLL over non-pad gold tokens).
    Note: if every gold token equals pad_id the result is NaN/Inf, matching
    torch.nn.NLLLoss(ignore_index=pad_id) on an all-ignored batch.
    """
    B, S, V = model_output.shape
    assert tgt.shape == (B, S)
    assert S >= 2, "need at least 2 tokens for a teacher-forced loss"
    Sm1 = S - 1

    itemsize = jnp.dtype(model_output.dtype).itemsize
    sub = 16 if itemsize <= 2 else 8                     # bf16 sublane packing

    # seq tile: multiple of the sublane pack, capped at tile_s / padded Sm1.
    ts = min(_round_up(tile_s, sub), _round_up(Sm1, sub))
    # vocab tile: full V if it fits one vreg row, otherwise a multiple of 128.
    if V <= 128:
        tv = V
    else:
        tv = min(_round_up(tile_v, 128), _round_up(V, 128))

    # Cap one logp block at ~8 MiB so 2x double-buffered blocks fit every
    # generation's VMEM (v7x: 64 MiB physical; v5e: 16 MiB default scoped).
    MAX_BLOCK_BYTES = 8 << 20
    while ts * tv * itemsize > MAX_BLOCK_BYTES and tv > 128:
        tv = _round_up(tv // 2, 128)
    while ts * tv * itemsize > MAX_BLOCK_BYTES and ts > sub:
        ts = _round_up(ts // 2, sub)

    num_t = pl.cdiv(Sm1, ts)
    num_v = pl.cdiv(V, tv)

    # Explicit VMEM budget: double-buffered logp + gold + headroom, clamped
    # below the chip's physical capacity (leaves >= 8 MiB headroom).
    vmem_cap = 64 << 20
    try:
        vmem_cap = int(getattr(pltpu.get_tpu_info(), "vmem_capacity_bytes",
                               vmem_cap))
    except Exception:
        pass
    block_bytes = ts * tv * itemsize
    need = 2 * block_bytes + 4 * ts * 2 + (4 << 20)
    vmem_limit = max(min(max(need, 32 << 20), vmem_cap - (8 << 20)), need)

    # Shifted gold; valid-token count is computed in XLA (kernel only sums).
    gold = tgt[:, 1:].astype(jnp.int32)
    count = jnp.sum(gold != pad_id).astype(jnp.float32)
    # Pre-mask ignored positions to -1 so the hot path needs no ignore test.
    gold = jnp.where(gold == pad_id, -1, gold)
    pad_rows = num_t * ts - Sm1
    if pad_rows:
        gold = jnp.pad(gold, ((0, 0), (0, pad_rows)), constant_values=-1)
    gold = gold[..., None]                                # (B, num_t*ts, 1)

    sums = pl.pallas_call(
        _make_nll_kernel(tv),
        out_shape=jax.ShapeDtypeStruct((B, num_t, 1), jnp.float32),
        grid_spec=pltpu.PrefetchScalarGridSpec(
            num_scalar_prefetch=0,
            grid=(B, num_t, num_v),
            in_specs=[
                pl.BlockSpec((1, ts, tv), lambda b, t, v: (b, t, v)),
                pl.BlockSpec((1, ts, 1), lambda b, t, v: (b, t, 0)),
            ],
            out_specs=pl.BlockSpec((1, 1, 1), lambda b, t, v: (b, t, 0)),
        ),
        compiler_params=pltpu.CompilerParams(
            dimension_semantics=("parallel", "parallel", "arbitrary"),
            vmem_limit_bytes=int(vmem_limit)),
        cost_estimate=pl.CostEstimate(
            flops=3 * B * Sm1 * V,
            transcendentals=0,
            bytes_accessed=int(itemsize) * B * S * V
                           + 4 * B * Sm1 + 4 * B * num_t),
    )(model_output, gold)

    # Tiny final reduction over (batch, seq-tile) partials (done in XLA).
    return -(jnp.sum(sums) / count)


def _reference_loss(model_output, tgt, pad_id):
    """Pure-JAX reference mirroring torch NLLLoss(ignore_index=pad_id)."""
    pred = model_output[:, :-1].astype(jnp.float32)       # (B, S-1, V)
    gold = tgt[:, 1:].astype(jnp.int32)                   # (B, S-1)
    picked = jnp.take_along_axis(pred, gold[..., None], axis=-1)[..., 0]
    mask = gold != pad_id
    total = jnp.sum(jnp.where(mask, picked, 0.0))
    cnt = jnp.sum(mask.astype(jnp.float32))
    return -total / cnt


def _check(model_output, tgt, pad_id, **kw):
    loss = jax.block_until_ready(transformer_loss(model_output, tgt, pad_id, **kw))
    ref = _reference_loss(model_output, tgt, pad_id)
    assert loss.shape == (), loss.shape
    assert loss.dtype == jnp.float32
    assert jnp.allclose(loss, ref, atol=1e-5, rtol=1e-5), (loss, ref)


if __name__ == "__main__":
    pad_id = 0
    key = jax.random.PRNGKey(0)

    # Test 1: small single-tile case (batch=2, seq=9 -> 8 predicted, vocab=128).
    k1, k2, k3, k4, k5, k6 = jax.random.split(key, 6)
    logits = jax.random.normal(k1, (2, 9, 128), dtype=jnp.float32)
    mo = jax.nn.log_softmax(logits, axis=-1)              # NLLLoss expects log-probs
    tgt = jax.random.randint(k2, (2, 9), 0, 128, dtype=jnp.int32)
    tgt = tgt.at[:, -2:].set(pad_id)                      # trailing padding
    tgt = tgt.at[0, 3].set(pad_id)                        # mid-sequence pad
    _check(mo, tgt, pad_id)

    # Test 2: multi-tile grid (2 seq tiles x 2 vocab tiles) with accumulation
    # across the vocab axis and per-(b, seq-tile) partial outputs.
    logits2 = jax.random.normal(k3, (2, 17, 256), dtype=jnp.float32)
    mo2 = jax.nn.log_softmax(logits2, axis=-1)
    tgt2 = jax.random.randint(k4, (2, 17), 0, 256, dtype=jnp.int32)
    tgt2 = tgt2.at[:, -3:].set(pad_id)
    tgt2 = tgt2.at[1, 5].set(pad_id)
    _check(mo2, tgt2, pad_id, tile_s=8, tile_v=128)

    # Test 3: bf16 log-probs (HBM traffic halves; kernel upcasts per tile).
    logits3 = jax.random.normal(k5, (2, 17, 128), dtype=jnp.float32)
    mo3 = jax.nn.log_softmax(logits3, axis=-1).astype(jnp.bfloat16)
    tgt3 = jax.random.randint(k6, (2, 17), 0, 128, dtype=jnp.int32)
    tgt3 = tgt3.at[:, -2:].set(pad_id)
    _check(mo3, tgt3, pad_id)

    print("KERNEL_OK")
</pallas_src>

<mosaic_0001>
module attributes {stable_mosaic.version = 11 : i64} {
  func.func @kernel(%arg0: i32, %arg1: i32, %arg2: i32, %arg3: memref<1x8x128xf32, #tpu.memory_space<vmem>>, %arg4: memref<1x8x1xi32, #tpu.memory_space<vmem>>, %arg5: memref<1x1x1xf32, #tpu.memory_space<vmem>>) attributes {dimension_semantics = [#tpu.dimension_semantics<parallel>, #tpu.dimension_semantics<parallel>, #tpu.dimension_semantics<arbitrary>], iteration_bounds = array<i64: 2, 1, 1>, scalar_prefetch = 0 : i64, scratch_operands = 0 : i64, tpu.core_type = #tpu.core_type<tc>, window_params = [{transform_indices = @transform_0, window_bounds = array<i64: 1, 8, 128>}, {transform_indices = @transform_1, window_bounds = array<i64: 1, 8, 1>}, {transform_indices = @transform_2, window_bounds = array<i64: 1, 1, 1>}]} {
    %c0_i32 = arith.constant 0 : i32
    %0 = arith.cmpi eq, %arg2, %c0_i32 : i32
    %1 = arith.extui %0 : i1 to i32
    %c0_i32_0 = arith.constant 0 : i32
    %2 = arith.cmpi ne, %1, %c0_i32_0 : i32
    scf.if %2 {
      %cst_13 = arith.constant 0.000000e+00 : f32
      %19 = vector.broadcast %cst_13 : f32 to vector<1x1x1xf32>
      %c0_14 = arith.constant 0 : index
      %c0_15 = arith.constant 0 : index
      %c0_16 = arith.constant 0 : index
      %20 = vector.load %arg5[%c0_14, %c0_15, %c0_16] : memref<1x1x1xf32, #tpu.memory_space<vmem>>, vector<1x1x1xf32>
      tpu.vector_store %arg5[%c0_14, %c0_15, %c0_16], %19 {strides = array<i32>} : memref<1x1x1xf32, #tpu.memory_space<vmem>>, vector<1x1x1xf32>,
    } else {
    }
    %c0 = arith.constant 0 : index
    %c0_1 = arith.constant 0 : index
    %c0_2 = arith.constant 0 : index
    %3 = vector.load %arg3[%c0, %c0_1, %c0_2] : memref<1x8x128xf32, #tpu.memory_space<vmem>>, vector<1x8x128xf32>
    %c0_3 = arith.constant 0 : index
    %c0_4 = arith.constant 0 : index
    %c0_5 = arith.constant 0 : index
    %4 = vector.load %arg4[%c0_3, %c0_4, %c0_5] : memref<1x8x1xi32, #tpu.memory_space<vmem>>, vector<1x8x1xi32>
    %c128_i32 = arith.constant 128 : i32
    %5 = arith.muli %arg2, %c128_i32 : i32
    %6 = vector.broadcast %5 : i32 to vector<1x8x1xi32>
    %7 = arith.subi %4, %6 : vector<1x8x1xi32>
    %8 = tpu.iota {dimensions = array<i32: 2>} : vector<1x1x128xi32>
    %9 = vector.broadcast %8 : vector<1x1x128xi32> to vector<1x8x128xi32>
    %10 = vector.broadcast %7 : vector<1x8x1xi32> to vector<1x8x128xi32>
    %11 = arith.cmpi eq, %9, %10 : vector<1x8x128xi32>
    %c0_6 = arith.constant 0 : index
    %c0_7 = arith.constant 0 : index
    %c0_8 = arith.constant 0 : index
    %12 = vector.load %arg5[%c0_6, %c0_7, %c0_8] : memref<1x1x1xf32, #tpu.memory_space<vmem>>, vector<1x1x1xf32>
    %cst = arith.constant 0.000000e+00 : f32
    %13 = vector.broadcast %cst : f32 to vector<1x8x128xf32>
    %14 = arith.select %11, %3, %13 : vector<1x8x128xi1>, vector<1x8x128xf32>
    %cst_9 = arith.constant dense<0.000000e+00> : vector<1xf32>
    %15 = vector.multi_reduction <add>, %14, %cst_9 [1, 2] : vector<1x8x128xf32> to vector<1xf32>
    %16 = vector.shape_cast %15 : vector<1xf32> to vector<1x1x1xf32>
    %17 = arith.addf %12, %16 : vector<1x1x1xf32>
    %c0_10 = arith.constant 0 : index
    %c0_11 = arith.constant 0 : index
    %c0_12 = arith.constant 0 : index
    %18 = vector.load %arg5[%c0_10, %c0_11, %c0_12] : memref<1x1x1xf32, #tpu.memory_space<vmem>>, vector<1x1x1xf32>
    tpu.vector_store %arg5[%c0_10, %c0_11, %c0_12], %17 {strides = array<i32>} : memref<1x1x1xf32, #tpu.memory_space<vmem>>, vector<1x1x1xf32>,
    return
  }
  func.func @transform_0(%arg0: i32, %arg1: i32, %arg2: i32) -> (i32, i32, i32) {
    %c0_i32 = arith.constant 0 : i32
    return %arg0, %arg1, %arg2 : i32, i32, i32
  }
  func.func @transform_1(%arg0: i32, %arg1: i32, %arg2: i32) -> (i32, i32, i32) {
    %c0_i32 = arith.constant 0 : i32
    %c0_i32_0 = arith.constant 0 : i32
    return %arg0, %arg1, %c0_i32 : i32, i32, i32
  }
  func.func @transform_2(%arg0: i32, %arg1: i32, %arg2: i32) -> (i32, i32, i32) {
    %c0_i32 = arith.constant 0 : i32
    %c0_i32_0 = arith.constant 0 : i32
    return %arg0, %arg1, %c0_i32 : i32, i32, i32
  }
}

</mosaic_0001>

<bundles_post_ra>
// kernel: tpu_custom_call.1
= control target key start
LH: loop header
LB: loop body
LE: loop exit
PB: predicated region body
PF: predicated region fallthrough
CT: control target
= control target key end

     0   :  { %s418_s9 = smov 0   ;;  %s420_s10 = smov 0   ;;  %s456_s0 = inlined_call_operand.vmem [shape: f32[2,9,128], index: 0, kind: input, shape index: {}]   ;;  %s457_s1 = inlined_call_operand.vmem [shape: s32[2,8,1], index: 1, kind: input, shape index: {}]   ;;  %s458_s2 = inlined_call_operand.vmem [shape: f32[2,1,1], index: 2, kind: output, shape index: {}]  }
   0x1   :  { %s422_s11 = smov 0  }
   0x2 LB: > { %s31_s12 = sadd.s32 1, %s395_s10  ;;  %p343_p0 = scmp.ge.s32.totalorder %s399_s11, 1  ;;  %s399_s11 = sphi %s422_s11, %s12_s11   ;;  %s395_s10 = sphi %s420_s10, %s460_s10   ;;  %s391_s9 = sphi %s418_s9, %s459_s9  }
   0x3   : > { %p33_p1 = scmp.ge.s32.totalorder %s31_s12, 2  ;;  %p157_p2 = scmp.lt.s32.totalorder %s399_s11, 3 }
   0x5   : > { %s462_s12 = smov (%p33_p1, %s31_s12), 0  ;;  %p158_p3 = pnand %p343_p0, %p157_p2 }
   0x6   : > { %p193_p4 = scmp.lt.s32.totalorder (!%p158_p3), %s391_s9, 1 }
   0x7   : > { %161 = sbr.rel (%p158_p3) target bundleno = 264 (0x108), region = 28 }
   0xc   : > { %v401_v0 = vmov 0   ;;  %s464_s9 = smov (!%p193_p4, %s391_s9), 1  ;;  %vm221_vm0 = vcmask 0   ;;  %v402_v2 = vmov 0.0   ;;  %v228_v3 = vlaneseq }
   0xd   : > { %376 = vset.pattern.permute.xlu0 %v401_v0  ;;  %s346_s13 = sshll.u32 %s464_s9, 3  ;;  %s216_s19 = scalar_lea.vmem %s458_s2, %s464_s9 }
   0xe   : > { %s210_s16 = scalar_lea.vmem %s457_s1, %s346_s13  ;;  %222 = vst.msk [vmem:[%s216_s19] sm:$0x1] %vm221_vm0, %v402_v2  ;;  %s349_s20 = sshll.u32 %s464_s9, 4  ;;  %v229_v4 = vand.u32 127, %v228_v3 }
   0xf   : > { %v224_v1 = vld [vmem:[%s210_s16] sm:$0xff]  ;;  %s203_s23 = scalar_lea.vmem %s456_s0, %s349_s20 }
  0x10   : > { %231 = vperm.xlu0 %376, %v224_v1   ;;  %v223_v5 = vld [vmem:[%s203_s23] sm:$0xff] }
  0x15   : > { %v234_v14 = vld [vmem:[%s216_s19] sm:$0x1] }
  0x82   : > { %v232_v6 = vpop.permute.xlu0 %231 }
  0x83   : > { %vm233_vm1 = vcmp.eq.s32.totalorder %v229_v4, %v232_v6 }
  0x84   : > { %v235_v7 = vsel %vm233_vm1, %v223_v5, 0.0 }
  0x85   : > { %236 = vadd.xlane.f32.xlu0 %v235_v7 }
  0xf8   : > { %v237_v8 = vpop.xlane.xlu0 %236 }
  0xf9   : > { %v238_v9 = vrot.slane %v237_v8, 4 }
  0xfb   : > { %v239_v10 = vadd.f32 %v238_v9, %v237_v8 }
  0xfd   : > { %v240_v11 = vrot.slane %v239_v10, 2 }
  0xff   : > { %v241_v12 = vadd.f32 %v240_v11, %v239_v10 }
 0x101   : > { %v242_v13 = vrot.slane %v241_v12, 1 }
 0x103   : > { %v243_v15 = vadd.f32 %v242_v13, %v241_v12 }
 0x105   : > { %v244_v16 = vadd.f32 %v243_v15, %v234_v14 }
 0x107   : > { %246 = vst.msk [vmem:[%s216_s19] sm:$0x1] %vm221_vm0, %v244_v16 }
 0x108 PF: > { %s12_s11 = sadd.s32 1, %s399_s11   ;;  %s459_s9 = smov %s395_s10 }
 0x109   : > { %p9_p5 = scmp.ge.s32.totalorder %s12_s11, 4   ;;  %s460_s10 = smov %s462_s12 }
 0x10b   :  { %11 = sbr.rel (!%p9_p5) target bundleno = 2 (0x2), region = 65 }

</bundles_post_ra>
